<compile_context>
chip_gen: v6e
topology: v6e:2x2x1
jax: 0.10.0
libtpu: 0.0.40
codegen_flags: <defaults>
</compile_context>

<pallas_src>
import functools
import math

import jax
import jax.numpy as jnp
from jax.experimental import pallas as pl
from jax.experimental.pallas import tpu as pltpu


def _rope_kernel(cos_ref, sin_ref, q_ref, k_ref, qo_ref, ko_ref,
                 *, num_heads, rotary_dim):
    H = num_heads
    D = rotary_dim
    half = D // 2

    cos = cos_ref[...].astype(jnp.float32)            # (T, D)
    sin = sin_ref[...].astype(jnp.float32)            # (T, D)

    # Cached cos/sin are emb = cat(freqs, freqs): both halves identical.
    # Fold the rotate_half sign into sin so only an unsigned per-head half
    # swap of q/k remains:  rotate_half(x) * sin == swap_halves(x) * sin_sg.
    sin_h = sin[:, :half]                              # (T, half)
    sin_sg = jnp.concatenate([-sin_h, sin_h], axis=-1)  # (T, D)

    cos_e = jnp.concatenate([cos] * H, axis=-1)        # (T, H*D)
    sin_e = jnp.concatenate([sin_sg] * H, axis=-1)     # (T, H*D)

    def swap_halves(x):
        # per-head [x1, x2] -> [x2, x1]; static lane slices only.
        parts = []
        for h in range(H):
            parts.append(x[:, h * D + half:(h + 1) * D])
            parts.append(x[:, h * D:h * D + half])
        return jnp.concatenate(parts, axis=-1)         # (T, H*D)

    q = q_ref[...].astype(jnp.float32)                 # (T, H*D)
    k = k_ref[...].astype(jnp.float32)
    qo_ref[...] = (q * cos_e + swap_halves(q) * sin_e).astype(qo_ref.dtype)
    ko_ref[...] = (k * cos_e + swap_halves(k) * sin_e).astype(ko_ref.dtype)


class RotaryEmbedding:
    def __init__(self, head_size, rotary_dim, max_position_embeddings=10240,
                 base=10000, dtype=jnp.float32):
        self.dim = rotary_dim
        self.base = base
        self.dtype = dtype
        self._max_block_tokens = 1024   # ~a few MB of double-buffered VMEM; fits all gens
        self._set_cos_sin_cache(max_position_embeddings)

    def _set_cos_sin_cache(self, seq_len):
        self.max_seq_len_cached = seq_len
        inv_freq = 1.0 / (self.base ** (jnp.arange(0, self.dim, 2, dtype=jnp.float32)
                                        / self.dim))
        t = jnp.arange(seq_len, dtype=jnp.float32)
        freqs = jnp.einsum('i,j->ij', t, inv_freq)
        emb = jnp.concatenate((freqs, freqs), axis=-1)            # (seq_len, D)
        self.cos_cached = jnp.cos(emb)[:, None, :].astype(self.dtype)  # (seq_len, 1, D)
        self.sin_cached = jnp.sin(emb)[:, None, :].astype(self.dtype)

    def __call__(self, positions, q, k):
        orig_shape = q.shape
        E = q.shape[-1]
        D = self.dim
        assert D % 2 == 0, "rotary_dim must be even"
        assert E % D == 0, "embed dim must be a multiple of rotary_dim"
        H = E // D
        lead = q.shape[:-1]
        N = int(math.prod(lead))

        # Mirror the PyTorch cache-regrow path when positions are concrete.
        # TODO(synk): under jit (traced positions) the cache cannot be regrown;
        # indices are clamped to the cached range instead.
        try:
            max_pos = int(jnp.max(positions))
        except jax.errors.ConcretizationTypeError:
            max_pos = None
        if max_pos is not None and max_pos >= self.max_seq_len_cached:
            self._set_cos_sin_cache(max_pos + 1)

        q2 = q.reshape(N, E)
        k2 = k.reshape(N, E)
        pos_flat = positions.reshape(N).astype(jnp.int32)

        # Pre-gather cos/sin rows once in XLA (cheap) so the kernel only sees
        # contiguous, token-blocked slabs -- no per-token DMA gather.
        cos_g = jnp.take(self.cos_cached[:, 0, :], pos_flat, axis=0,
                         mode="clip").astype(jnp.float32)          # (N, D)
        sin_g = jnp.take(self.sin_cached[:, 0, :], pos_flat, axis=0,
                         mode="clip").astype(jnp.float32)          # (N, D)

        T = N if N <= self._max_block_tokens else self._max_block_tokens
        grid = (pl.cdiv(N, T),)

        tok_spec_e = pl.BlockSpec((T, E), lambda i: (i, 0))
        tok_spec_d = pl.BlockSpec((T, D), lambda i: (i, 0))

        kernel = functools.partial(_rope_kernel, num_heads=H, rotary_dim=D)

        qo, ko = pl.pallas_call(
            kernel,
            out_shape=(jax.ShapeDtypeStruct((N, E), q.dtype),
                       jax.ShapeDtypeStruct((N, E), k.dtype)),
            grid_spec=pltpu.PrefetchScalarGridSpec(
                num_scalar_prefetch=0,
                grid=grid,
                in_specs=[tok_spec_d, tok_spec_d, tok_spec_e, tok_spec_e],
                out_specs=[tok_spec_e, tok_spec_e],
            ),
            compiler_params=pltpu.CompilerParams(
                dimension_semantics=("parallel",)),
        )(cos_g, sin_g, q2, k2)

        return qo.reshape(orig_shape), ko.reshape(orig_shape)


def _reference(rope, positions, q, k):
    """Pure-JAX reference mirroring the PyTorch loop semantics."""
    B, S, E = q.shape
    D = rope.dim
    H = E // D
    q4 = q.reshape(B, S, H, D)
    k4 = k.reshape(B, S, H, D)
    cos = rope.cos_cached[positions, 0, :][:, :, None, :]   # (B,S,1,D)
    sin = rope.sin_cached[positions, 0, :][:, :, None, :]

    def rot(x):
        half = x.shape[-1] // 2
        return jnp.concatenate((-x[..., half:], x[..., :half]), axis=-1)

    qo = q4 * cos + rot(q4) * sin
    ko = k4 * cos + rot(k4) * sin
    return qo.reshape(B, S, E), ko.reshape(B, S, E)


if __name__ == "__main__":
    key = jax.random.PRNGKey(0)
    k1, k2, k3 = jax.random.split(key, 3)

    B, S = 2, 8
    num_heads, rotary_dim = 4, 32
    embed_dim = num_heads * rotary_dim          # 128

    positions = jax.random.randint(k1, (B, S), 0, 64, dtype=jnp.int32)
    q = jax.random.normal(k2, (B, S, embed_dim), dtype=jnp.float32)
    k = jax.random.normal(k3, (B, S, embed_dim), dtype=jnp.float32)

    rope = RotaryEmbedding(head_size=rotary_dim, rotary_dim=rotary_dim,
                           max_position_embeddings=10240, base=10000)

    q_out, k_out = rope(positions, q, k)
    jax.block_until_ready((q_out, k_out))

    q_ref, k_ref = _reference(rope, positions, q, k)
    assert jnp.allclose(q_out, q_ref, atol=1e-5, rtol=1e-5)
    assert jnp.allclose(k_out, k_ref, atol=1e-5, rtol=1e-5)

    print("KERNEL_OK")
</pallas_src>

<mosaic_0001>
module attributes {stable_mosaic.version = 11 : i64} {
  func.func @_rope_kernel(%arg0: i32, %arg1: memref<16x32xf32, #tpu.memory_space<vmem>>, %arg2: memref<16x32xf32, #tpu.memory_space<vmem>>, %arg3: memref<16x128xf32, #tpu.memory_space<vmem>>, %arg4: memref<16x128xf32, #tpu.memory_space<vmem>>, %arg5: memref<16x128xf32, #tpu.memory_space<vmem>>, %arg6: memref<16x128xf32, #tpu.memory_space<vmem>>) attributes {dimension_semantics = [#tpu.dimension_semantics<parallel>], iteration_bounds = array<i64: 1>, scalar_prefetch = 0 : i64, scratch_operands = 0 : i64, tpu.core_type = #tpu.core_type<tc>, window_params = [{transform_indices = @transform_0, window_bounds = array<i64: 16, 32>}, {transform_indices = @transform_1, window_bounds = array<i64: 16, 32>}, {transform_indices = @transform_2, window_bounds = array<i64: 16, 128>}, {transform_indices = @transform_3, window_bounds = array<i64: 16, 128>}, {transform_indices = @transform_4, window_bounds = array<i64: 16, 128>}, {transform_indices = @transform_5, window_bounds = array<i64: 16, 128>}]} {
    %c0 = arith.constant 0 : index
    %c0_0 = arith.constant 0 : index
    %0 = vector.load %arg1[%c0, %c0_0] : memref<16x32xf32, #tpu.memory_space<vmem>>, vector<16x32xf32>
    %c0_1 = arith.constant 0 : index
    %c0_2 = arith.constant 0 : index
    %1 = vector.load %arg2[%c0_1, %c0_2] : memref<16x32xf32, #tpu.memory_space<vmem>>, vector<16x32xf32>
    %2 = vector.extract_strided_slice %1 {offsets = [0, 0], sizes = [16, 16], strides = [1, 1]} : vector<16x32xf32> to vector<16x16xf32>
    %cst = arith.constant 0.000000e+00 : f32
    %3 = vector.broadcast %cst : f32 to vector<16x16xf32>
    %4 = arith.subf %3, %2 : vector<16x16xf32>
    %5 = tpu.concatenate %4, %2 in 1 : vector<16x16xf32>, vector<16x16xf32> -> vector<16x32xf32>
    %6 = tpu.concatenate %0, %0, %0, %0 in 1 : vector<16x32xf32>, vector<16x32xf32>, vector<16x32xf32>, vector<16x32xf32> -> vector<16x128xf32>
    %7 = tpu.concatenate %5, %5, %5, %5 in 1 : vector<16x32xf32>, vector<16x32xf32>, vector<16x32xf32>, vector<16x32xf32> -> vector<16x128xf32>
    %c0_3 = arith.constant 0 : index
    %c0_4 = arith.constant 0 : index
    %8 = vector.load %arg3[%c0_3, %c0_4] : memref<16x128xf32, #tpu.memory_space<vmem>>, vector<16x128xf32>
    %c0_5 = arith.constant 0 : index
    %c0_6 = arith.constant 0 : index
    %9 = vector.load %arg4[%c0_5, %c0_6] : memref<16x128xf32, #tpu.memory_space<vmem>>, vector<16x128xf32>
    %10 = arith.mulf %8, %6 : vector<16x128xf32>
    %11 = vector.extract_strided_slice %8 {offsets = [0, 16], sizes = [16, 16], strides = [1, 1]} : vector<16x128xf32> to vector<16x16xf32>
    %12 = vector.extract_strided_slice %8 {offsets = [0, 0], sizes = [16, 16], strides = [1, 1]} : vector<16x128xf32> to vector<16x16xf32>
    %13 = vector.extract_strided_slice %8 {offsets = [0, 48], sizes = [16, 16], strides = [1, 1]} : vector<16x128xf32> to vector<16x16xf32>
    %14 = vector.extract_strided_slice %8 {offsets = [0, 32], sizes = [16, 16], strides = [1, 1]} : vector<16x128xf32> to vector<16x16xf32>
    %15 = vector.extract_strided_slice %8 {offsets = [0, 80], sizes = [16, 16], strides = [1, 1]} : vector<16x128xf32> to vector<16x16xf32>
    %16 = vector.extract_strided_slice %8 {offsets = [0, 64], sizes = [16, 16], strides = [1, 1]} : vector<16x128xf32> to vector<16x16xf32>
    %17 = vector.extract_strided_slice %8 {offsets = [0, 112], sizes = [16, 16], strides = [1, 1]} : vector<16x128xf32> to vector<16x16xf32>
    %18 = vector.extract_strided_slice %8 {offsets = [0, 96], sizes = [16, 16], strides = [1, 1]} : vector<16x128xf32> to vector<16x16xf32>
    %19 = tpu.concatenate %11, %12, %13, %14, %15, %16, %17, %18 in 1 : vector<16x16xf32>, vector<16x16xf32>, vector<16x16xf32>, vector<16x16xf32>, vector<16x16xf32>, vector<16x16xf32>, vector<16x16xf32>, vector<16x16xf32> -> vector<16x128xf32>
    %20 = arith.mulf %19, %7 : vector<16x128xf32>
    %21 = arith.addf %10, %20 : vector<16x128xf32>
    %c0_7 = arith.constant 0 : index
    %c0_8 = arith.constant 0 : index
    %22 = vector.load %arg5[%c0_7, %c0_8] : memref<16x128xf32, #tpu.memory_space<vmem>>, vector<16x128xf32>
    tpu.vector_store %arg5[%c0_7, %c0_8], %21 {strides = array<i32>} : memref<16x128xf32, #tpu.memory_space<vmem>>, vector<16x128xf32>,
    %23 = arith.mulf %9, %6 : vector<16x128xf32>
    %24 = vector.extract_strided_slice %9 {offsets = [0, 16], sizes = [16, 16], strides = [1, 1]} : vector<16x128xf32> to vector<16x16xf32>
    %25 = vector.extract_strided_slice %9 {offsets = [0, 0], sizes = [16, 16], strides = [1, 1]} : vector<16x128xf32> to vector<16x16xf32>
    %26 = vector.extract_strided_slice %9 {offsets = [0, 48], sizes = [16, 16], strides = [1, 1]} : vector<16x128xf32> to vector<16x16xf32>
    %27 = vector.extract_strided_slice %9 {offsets = [0, 32], sizes = [16, 16], strides = [1, 1]} : vector<16x128xf32> to vector<16x16xf32>
    %28 = vector.extract_strided_slice %9 {offsets = [0, 80], sizes = [16, 16], strides = [1, 1]} : vector<16x128xf32> to vector<16x16xf32>
    %29 = vector.extract_strided_slice %9 {offsets = [0, 64], sizes = [16, 16], strides = [1, 1]} : vector<16x128xf32> to vector<16x16xf32>
    %30 = vector.extract_strided_slice %9 {offsets = [0, 112], sizes = [16, 16], strides = [1, 1]} : vector<16x128xf32> to vector<16x16xf32>
    %31 = vector.extract_strided_slice %9 {offsets = [0, 96], sizes = [16, 16], strides = [1, 1]} : vector<16x128xf32> to vector<16x16xf32>
    %32 = tpu.concatenate %24, %25, %26, %27, %28, %29, %30, %31 in 1 : vector<16x16xf32>, vector<16x16xf32>, vector<16x16xf32>, vector<16x16xf32>, vector<16x16xf32>, vector<16x16xf32>, vector<16x16xf32>, vector<16x16xf32> -> vector<16x128xf32>
    %33 = arith.mulf %32, %7 : vector<16x128xf32>
    %34 = arith.addf %23, %33 : vector<16x128xf32>
    %c0_9 = arith.constant 0 : index
    %c0_10 = arith.constant 0 : index
    %35 = vector.load %arg6[%c0_9, %c0_10] : memref<16x128xf32, #tpu.memory_space<vmem>>, vector<16x128xf32>
    tpu.vector_store %arg6[%c0_9, %c0_10], %34 {strides = array<i32>} : memref<16x128xf32, #tpu.memory_space<vmem>>, vector<16x128xf32>,
    return
  }
  func.func @transform_0(%arg0: i32) -> (i32, i32) {
    %c0_i32 = arith.constant 0 : i32
    %c0_i32_0 = arith.constant 0 : i32
    return %arg0, %c0_i32 : i32, i32
  }
  func.func @transform_1(%arg0: i32) -> (i32, i32) {
    %c0_i32 = arith.constant 0 : i32
    %c0_i32_0 = arith.constant 0 : i32
    return %arg0, %c0_i32 : i32, i32
  }
  func.func @transform_2(%arg0: i32) -> (i32, i32) {
    %c0_i32 = arith.constant 0 : i32
    %c0_i32_0 = arith.constant 0 : i32
    return %arg0, %c0_i32 : i32, i32
  }
  func.func @transform_3(%arg0: i32) -> (i32, i32) {
    %c0_i32 = arith.constant 0 : i32
    %c0_i32_0 = arith.constant 0 : i32
    return %arg0, %c0_i32 : i32, i32
  }
  func.func @transform_4(%arg0: i32) -> (i32, i32) {
    %c0_i32 = arith.constant 0 : i32
    %c0_i32_0 = arith.constant 0 : i32
    return %arg0, %c0_i32 : i32, i32
  }
  func.func @transform_5(%arg0: i32) -> (i32, i32) {
    %c0_i32 = arith.constant 0 : i32
    %c0_i32_0 = arith.constant 0 : i32
    return %arg0, %c0_i32 : i32, i32
  }
}

</mosaic_0001>

<bundles_post_ra>
// kernel: tpu_custom_call.1
= control target key start
LH: loop header
LB: loop body
LE: loop exit
PB: predicated region body
PF: predicated region fallthrough
CT: control target
= control target key end

     0   :  { %11 = vsyncpa [#allocation3], 0  ;;  %s566_s0 = inlined_call_operand.hbm [shape: f32[16,32], index: 0, kind: input, shape index: {}]   ;;  %s567_s1 = inlined_call_operand.hbm [shape: f32[16,32], index: 1, kind: input, shape index: {}]   ;;  %s568_s2 = inlined_call_operand.hbm [shape: f32[16,128], index: 2, kind: input, shape index: {}]   ;;  %s569_s3 = inlined_call_operand.hbm [shape: f32[16,128], index: 3, kind: input, shape index: {}]   ;;  %s570_s4 = inlined_call_operand.hbm [shape: f32[16,128], index: 4, kind: output, shape index: {0}]   ;;  %s571_s5 = inlined_call_operand.hbm [shape: f32[16,128], index: 5, kind: output, shape index: {1}]  }
   0x1   :  { %12 = vsyncpa [#allocation6], 0 }
   0x2   :  { %13 = vsyncpa [#allocation9], 0 }
   0x3   :  { %14 = vsyncpa [#allocation4], 0 }
   0x4   :  { %15 = vsyncpa [#allocation12], 0  ;;  %s405_s18 = smov [#allocation5]   ;;  %s406_s20 = smov [#allocation2]  }
   0x5   :  { %s33_s19 = sshll.u32 %s405_s18, 4  ;;  %s21_s21 = sshll.u32 %s406_s20, 4  ;;  %s34_s19 = int_to_ptr.vmem [resolvable:$true] %s33_s19  ;;  %s22_s21 = int_to_ptr.vmem [resolvable:$true] %s21_s21 }
   0x6   :  { %s283_s22 = scalar_lea.vmem %s34_s19, 256  ;;  %p288_p1 = scmp.lt.s32.totalorder %s34_s19, %s34_s19 }
   0x7   :  { %p284_p0 = scmp.ne.s32.totalorder %s34_s19, %s283_s22  ;;  %p289_p2 = scmp.lt.s32.totalorder %s283_s22, %s283_s22 }
   0x9   :  { %p290_p3 = por %p289_p2, %p288_p1 }
   0xb   :  { %p291_p4 = pnand %p290_p3, %p284_p0 }
   0xd   :  { %294 = shalt.err (!%p291_p4)
}
   0xe   :  { %s407_s23 = smov 128   ;;  %s408_s24 = smov 8  }
   0xf   :  { %39 = dma.hbm_to_vmem [thread:$0]  %s567_s1, 256, %s34_s19, [#allocation6], %s407_s23, %s407_s23, %s408_s24  }
  0x10   :  { %s303_s27 = scalar_lea.vmem %s22_s21, 256  ;;  %p308_p6 = scmp.lt.s32.totalorder %s22_s21, %s22_s21 }
  0x11   :  { %p304_p5 = scmp.ne.s32.totalorder %s22_s21, %s303_s27  ;;  %p309_p7 = scmp.lt.s32.totalorder %s303_s27, %s303_s27 }
  0x13   :  { %p310_p8 = por %p309_p7, %p308_p6 }
  0x15   :  { %p311_p9 = pnand %p310_p8, %p304_p5 }
  0x17   :  { %314 = shalt.err (!%p311_p9)
}
  0x18   :  { %27 = dma.hbm_to_vmem [thread:$0]  %s566_s0, 256, %s22_s21, [#allocation3], %s407_s23, %s407_s23, %s408_s24  }
  0x19   :  { %s409_s30 = smov [#allocation7]   ;;  %s410_s7 = smov [#allocation8]  }
  0x1a   :  { %s45_s6 = sshll.u32 %s409_s30, 4  ;;  %s57_s8 = sshll.u32 %s410_s7, 4  ;;  %s46_s6 = int_to_ptr.vmem [resolvable:$true] %s45_s6  ;;  %s58_s8 = int_to_ptr.vmem [resolvable:$true] %s57_s8 }
  0x1b   :  { %s323_s1 = scalar_lea.vmem %s46_s6, 256  ;;  %p328_p11 = scmp.lt.s32.totalorder %s46_s6, %s46_s6 }
  0x1c   :  { %p324_p10 = scmp.ne.s32.totalorder %s46_s6, %s323_s1  ;;  %p329_p12 = scmp.lt.s32.totalorder %s323_s1, %s323_s1 }
  0x1e   :  { %p330_p13 = por %p329_p12, %p328_p11 }
  0x20   :  { %p331_p0 = pnand %p330_p13, %p324_p10 }
  0x22   :  { %334 = shalt.err (!%p331_p0)
}
  0x23   :  { %51 = dma.hbm_to_vmem [thread:$0]  %s568_s2, 256, %s46_s6, [#allocation6], %s407_s23, %s407_s23, %s408_s24  }
  0x24   :  { %s343_s0 = scalar_lea.vmem %s58_s8, 256  ;;  %p348_p2 = scmp.lt.s32.totalorder %s58_s8, %s58_s8 }
  0x25   :  { %p344_p1 = scmp.ne.s32.totalorder %s58_s8, %s343_s0  ;;  %p349_p3 = scmp.lt.s32.totalorder %s343_s0, %s343_s0 }
  0x27   :  { %p350_p4 = por %p349_p3, %p348_p2 }
  0x29   :  { %p351_p5 = pnand %p350_p4, %p344_p1 }
  0x2b   :  { %354 = shalt.err (!%p351_p5)
}
  0x2c   :  { %63 = dma.hbm_to_vmem [thread:$0]  %s569_s3, 256, %s58_s8, [#allocation9], %s407_s23, %s407_s23, %s408_s24  }
  0x2d   :  { %395 = dma.done.wait [#allocation3], 256  }
  0x2e   :  { %396 = vsyncadd [#allocation3], 4294967040 }
  0x2f   :  { %397 = dma.done.wait [#allocation6], 512  }
  0x30   :  { %398 = vsyncadd [#allocation6], 4294966784 }
  0x31   :  { %399 = dma.done.wait [#allocation9], 256  }
  0x32   :  { %400 = vsyncadd [#allocation9], 4294967040  ;;  %v78_v0 = vld [vmem:[#allocation5] sm:$0xff]  ;;  %v472_v1 = vld [vmem:[#allocation7] sm:$0xff]  ;;  %s411_s2 = smov 16   ;;  %s412_s13 = smov 112  }
  0x33   :  { %84 = vrot.lane.b32.xlu0 %v78_v0, %s411_s2  ;;  %156 = vrot.lane.b32.xlu1 %v472_v1, %s412_s13  ;;  %v79_v2 = vld [vmem:[#allocation5 + $0x8] sm:$0xff]  ;;  %v475_v3 = vld [vmem:[#allocation7 + $0x8] sm:$0xff]  ;;  %v482_v5 = vld [vmem:[#allocation8] sm:$0xff]  ;;  %s413_s3 = smov 32   ;;  %s414_s14 = smov 64   ;;  %v80_v8 = vsub.f32 0.0, %v78_v0 }
  0x34   :  { %v480_v4 = vld [vmem:[#allocation8 + $0x8] sm:$0xff]  ;;  %v488_v6 = vld [vmem:[#allocation2 + $0x8] sm:$0xff]  ;;  %v76_v7 = vld [vmem:[#allocation2] sm:$0xff]  ;;  %s415_s15 = smov 96   ;;  %vm90_vm0 = vcmask 130048   ;;  %v81_v10 = vsub.f32 0.0, %v79_v2 }
  0x35   :  { %vm113_vm1 = vcmask 261120   ;;  %vm172_vm2 = vcmask 392192   ;;  %vm116_vm3 = vcmask 523264   ;;  %vm177_vm4 = vcmask 654336   ;;  %s416_s16 = smov [#allocation10]   ;;  %s417_s18 = smov [#allocation11]  }
  0x36   :  { %vm119_vm5 = vcmask 785408   ;;  %vm182_vm6 = vcmask 916480   ;;  %s232_s17 = sshll.u32 %s416_s16, 4  ;;  %s244_s19 = sshll.u32 %s417_s18, 4  ;;  %s233_s17 = int_to_ptr.vmem [resolvable:$true] %s232_s17  ;;  %s245_s19 = int_to_ptr.vmem [resolvable:$true] %s244_s19 }
  0x37   :  { %86 = vrot.lane.b32.xlu0 %v79_v2, %s411_s2  ;;  %158 = vrot.lane.b32.xlu1 %v475_v3, %s412_s13  ;;  %s355_s20 = scalar_lea.vmem %s233_s17, 256  ;;  %p360_p7 = scmp.lt.s32.totalorder %s233_s17, %s233_s17 }
  0x38   :  { %p356_p6 = scmp.ne.s32.totalorder %s233_s17, %s355_s20  ;;  %p361_p8 = scmp.lt.s32.totalorder %s355_s20, %s355_s20 }
  0x3a   :  { %p362_p9 = por %p361_p8, %p360_p7 }
  0x3b   :  { %162 = vrot.lane.b32.xlu0 %v472_v1, %s411_s2  ;;  %164 = vrot.lane.b32.xlu1 %v475_v3, %s411_s2 }
  0x3c   :  { %p363_p10 = pnand %p362_p9, %p356_p6 }
  0x3f   :  { %197 = vrot.lane.b32.xlu1 %v480_v4, %s412_s13  ;;  %195 = vrot.lane.b32.xlu0 %v482_v5, %s412_s13 }
  0x43   :  { %203 = vrot.lane.b32.xlu1 %v480_v4, %s411_s2  ;;  %201 = vrot.lane.b32.xlu0 %v482_v5, %s411_s2 }
  0x47   :  { %97 = vrot.lane.b32.xlu1 %v488_v6, %s413_s3  ;;  %95 = vrot.lane.b32.xlu0 %v76_v7, %s413_s3 }
  0x4b   :  { %103 = vrot.lane.b32.xlu1 %v488_v6, %s414_s14  ;;  %101 = vrot.lane.b32.xlu0 %v76_v7, %s414_s14 }
  0x4f   :  { %109 = vrot.lane.b32.xlu1 %v488_v6, %s415_s15  ;;  %107 = vrot.lane.b32.xlu0 %v76_v7, %s415_s15 }
  0xa5   :  { %v85_v9 = vpop.permute.xlu0 %84  ;;  %v157_v14 = vpop.permute.xlu1 %156 }
  0xa6   :  { %v91_v11 = vsel %vm90_vm0, %v80_v8, %v85_v9 }
  0xa7   :  { %124 = vrot.lane.b32.xlu0 %v91_v11, %s413_s3 }
  0xa9   :  { %v87_v12 = vpop.permute.xlu0 %86  ;;  %v159_v15 = vpop.permute.xlu1 %158 }
  0xaa   :  { %v495_v13 = vsel %vm90_vm0, %v81_v10, %v87_v12 }
  0xab   :  { %126 = vrot.lane.b32.xlu1 %v495_v13, %s413_s3  ;;  %130 = vrot.lane.b32.xlu0 %v91_v11, %s414_s14 }
  0xad   :  { %v163_v16 = vpop.permute.xlu0 %162  ;;  %v500_v17 = vpop.permute.xlu1 %164 }
  0xae   :  { %v168_v25 = vsel %vm90_vm0, %v157_v14, %v163_v16  ;;  %v169_v27 = vsel %vm90_vm0, %v159_v15, %v500_v17 }
  0xaf   :  { %132 = vrot.lane.b32.xlu1 %v495_v13, %s414_s14  ;;  %136 = vrot.lane.b32.xlu0 %v91_v11, %s415_s15  ;;  %v170_v28 = vsel %vm113_vm1, %v168_v25, %v157_v14  ;;  %v171_v32 = vsel %vm113_vm1, %v169_v27, %v159_v15 }
  0xb0   :  { %v173_v34 = vsel %vm172_vm2, %v170_v28, %v163_v16  ;;  %v174_v37 = vsel %vm172_vm2, %v171_v32, %v500_v17 }
  0xb1   :  { %v196_v18 = vpop.permute.xlu0 %195  ;;  %v198_v19 = vpop.permute.xlu1 %197  ;;  %v175_v38 = vsel %vm116_vm3, %v173_v34, %v157_v14  ;;  %v176_v44 = vsel %vm116_vm3, %v174_v37, %v159_v15 }
  0xb2   :  { %v178_v45 = vsel %vm177_vm4, %v175_v38, %v163_v16  ;;  %v179_v51 = vsel %vm177_vm4, %v176_v44, %v500_v17 }
  0xb3   :  { %138 = vrot.lane.b32.xlu1 %v495_v13, %s415_s15  ;;  %v180_v54 = vsel %vm119_vm5, %v178_v45, %v157_v14  ;;  %v181_v62 = vsel %vm119_vm5, %v179_v51, %v159_v15 }
  0xb4   :  { %v183_v63 = vsel %vm182_vm6, %v180_v54, %v163_v16 }
  0xb5   :  { %v202_v20 = vpop.permute.xlu0 %201  ;;  %v502_v21 = vpop.permute.xlu1 %203 }
  0xb6   :  { %v207_v26 = vsel %vm90_vm0, %v196_v18, %v202_v20  ;;  %v208_v29 = vsel %vm90_vm0, %v198_v19, %v502_v21 }
  0xb7   :  { %v209_v30 = vsel %vm113_vm1, %v207_v26, %v196_v18  ;;  %v210_v35 = vsel %vm113_vm1, %v208_v29, %v198_v19 }
  0xb8   :  { %v211_v36 = vsel %vm172_vm2, %v209_v30, %v202_v20  ;;  %v212_v39 = vsel %vm172_vm2, %v210_v35, %v502_v21 }
  0xb9   :  { %v96_v22 = vpop.permute.xlu0 %95  ;;  %v98_v23 = vpop.permute.xlu1 %97  ;;  %v213_v40 = vsel %vm116_vm3, %v211_v36, %v196_v18  ;;  %v214_v46 = vsel %vm116_vm3, %v212_v39, %v198_v19 }
  0xba   :  { %v114_v43 = vsel %vm113_vm1, %v76_v7, %v96_v22  ;;  %v215_v47 = vsel %vm177_vm4, %v213_v40, %v202_v20  ;;  %v115_v52 = vsel %vm113_vm1, %v488_v6, %v98_v23  ;;  %v216_v53 = vsel %vm177_vm4, %v214_v46, %v502_v21 }
  0xbb   :  { %v217_v55 = vsel %vm119_vm5, %v215_v47, %v196_v18  ;;  %v218_v6 = vsel %vm119_vm5, %v216_v53, %v198_v19 }
  0xbc   :  { %v219_v0 = vsel %vm182_vm6, %v217_v55, %v202_v20  ;;  %v184_v20 = vsel %vm182_vm6, %v181_v62, %v500_v17 }
  0xbd   :  { %v102_v24 = vpop.permute.xlu0 %101  ;;  %v104_v31 = vpop.permute.xlu1 %103 }
  0xbe   :  { %v117_v48 = vsel %vm116_vm3, %v114_v43, %v102_v24  ;;  %v118_v58 = vsel %vm116_vm3, %v115_v52, %v104_v31 }
  0xc1   :  { %v108_v33 = vpop.permute.xlu0 %107  ;;  %v110_v41 = vpop.permute.xlu1 %109 }
  0xc2   :  { %v120_v56 = vsel %vm119_vm5, %v117_v48, %v108_v33 }
  0xc3   :  { %v152_v7 = vmul.f32 %v472_v1, %v120_v56  ;;  %v191_v8 = vmul.f32 %v482_v5, %v120_v56  ;;  %v220_v1 = vsel %vm182_vm6, %v218_v6, %v502_v21 }
 0x119   :  { %v125_v42 = vpop.permute.xlu0 %124 }
 0x11a   :  { %v142_v57 = vsel %vm113_vm1, %v91_v11, %v125_v42  ;;  %v121_v11 = vsel %vm119_vm5, %v118_v58, %v110_v41 }
 0x11b   :  { %v153_v19 = vmul.f32 %v475_v3, %v121_v11  ;;  %v192_v22 = vmul.f32 %v480_v4, %v121_v11 }
 0x11d   :  { %v127_v49 = vpop.permute.xlu1 %126  ;;  %v131_v50 = vpop.permute.xlu0 %130 }
 0x11e   :  { %v144_v59 = vsel %vm116_vm3, %v142_v57, %v131_v50  ;;  %v143_v12 = vsel %vm113_vm1, %v495_v13, %v127_v49 }
 0x121   :  { %v133_v60 = vpop.permute.xlu1 %132  ;;  %v137_v61 = vpop.permute.xlu0 %136 }
 0x122   :  { %v146_v2 = vsel %vm119_vm5, %v144_v59, %v137_v61  ;;  %v145_v14 = vsel %vm116_vm3, %v143_v12, %v133_v60 }
 0x123   :  { %v185_v9 = vmul.f32 %v183_v63, %v146_v2  ;;  %v221_v10 = vmul.f32 %v219_v0, %v146_v2 }
 0x125   :  { %v187_v15 = vadd.f32 %v185_v9, %v152_v7  ;;  %v223_v16 = vadd.f32 %v221_v10, %v191_v8  ;;  %v139_v18 = vpop.permute.xlu1 %138 }
 0x126   :  { %v147_v5 = vsel %vm119_vm5, %v145_v14, %v139_v18 }
 0x127   :  { %189 = vst [vmem:[#allocation10] sm:$0xff] %v187_v15  ;;  %225 = vst [vmem:[#allocation11] sm:$0xff] %v223_v16  ;;  %v186_v13 = vmul.f32 %v184_v20, %v147_v5  ;;  %v222_v23 = vmul.f32 %v220_v1, %v147_v5 }
 0x129   :  { %v188_v24 = vadd.f32 %v186_v13, %v153_v19  ;;  %v224_v25 = vadd.f32 %v222_v23, %v192_v22 }
 0x12b   :  { %190 = vst [vmem:[#allocation10 + $0x8] sm:$0xff] %v188_v24  ;;  %226 = vst [vmem:[#allocation11 + $0x8] sm:$0xff] %v224_v25 }
 0x12c   :  { %366 = shalt.err (!%p363_p10)
}
 0x12d   :  { %238 = dma.vmem_to_hbm [thread:$0]  %s233_s17, 256, %s570_s4, [#allocation4], %s407_s23, %s407_s23, %s408_s24  }
 0x12e   :  { %s375_s25 = scalar_lea.vmem %s245_s19, 256  ;;  %p380_p12 = scmp.lt.s32.totalorder %s245_s19, %s245_s19 }
 0x12f   :  { %p376_p11 = scmp.ne.s32.totalorder %s245_s19, %s375_s25  ;;  %p381_p13 = scmp.lt.s32.totalorder %s375_s25, %s375_s25 }
 0x131   :  { %p382_p0 = por %p381_p13, %p380_p12 }
 0x133   :  { %p383_p1 = pnand %p382_p0, %p376_p11 }
 0x135   :  { %386 = shalt.err (!%p383_p1)
}
 0x136   :  { %250 = dma.vmem_to_hbm [thread:$0]  %s245_s19, 256, %s571_s5, [#allocation12], %s407_s23, %s407_s23, %s408_s24  }
 0x137   :  { %401 = dma.done.wait [#allocation4], 256  }
 0x138   :  { %402 = vsyncadd [#allocation4], 4294967040 }
 0x139   :  { %403 = dma.done.wait [#allocation12], 256  }
 0x13a   :  { %404 = vsyncadd [#allocation12], 4294967040 }
 0x13b   :  { %257 = vsyncpa [#allocation3], 1 }
 0x13c   :  { %258 = vsyncpa [#allocation6], 1 }
 0x13d   :  { %259 = vsyncpa [#allocation9], 1 }
 0x13e   :  { %260 = vsyncpa [#allocation4], 1 }
 0x13f   :  { %261 = vsyncpa [#allocation12], 1 }

</bundles_post_ra>
